<compile_context>
chip_gen: v6e
topology: v6e:2x2x1
jax: 0.10.0
libtpu: 0.0.40
codegen_flags: <defaults>
</compile_context>

<pallas_src>
import functools
import math

import jax
import jax.numpy as jnp
import numpy as np
from jax.experimental import pallas as pl
from jax.experimental.pallas import tpu as pltpu


def _leaky_relu(x, slope=0.2):
    # torch.nn.LeakyReLU(0.2): x if x >= 0 else 0.2 * x   (pure VPU)
    return jnp.where(x >= 0, x, slope * x)


def _decoder_kernel(
    x_ref,
    w1_ref, b1_ref, s1_ref, t1_ref,
    w2_ref, b2_ref, s2_ref, t2_ref,
    w3_ref, b3_ref,
    o_ref,
    h_ref,                      # VMEM scratch: (B, hid_dim2), persists across grid
):
    # Layers 1 & 2 (+ folded BatchNorms) are computed only once, on the first
    # output tile; the result is kept in VMEM scratch for all later tiles.
    @pl.when(pl.program_id(0) == 0)
    def _():
        x = x_ref[...]                                               # (B, in_dim)
        h = jnp.dot(x, w1_ref[...], preferred_element_type=jnp.float32) + b1_ref[...]
        h = _leaky_relu(h)
        h = h * s1_ref[...] + t1_ref[...]                            # BN1 (eval, folded)
        h = jnp.dot(h, w2_ref[...], preferred_element_type=jnp.float32) + b2_ref[...]
        h = _leaky_relu(h)
        h = h * s2_ref[...] + t2_ref[...]                            # BN2 (eval, folded)
        h_ref[...] = h

    # Layer 3: one output tile per grid step -> one lane-dense store.
    out = jnp.dot(h_ref[...], w3_ref[...], preferred_element_type=jnp.float32) + b3_ref[...]
    o_ref[...] = _leaky_relu(out).astype(o_ref.dtype)


def decoder_profile(x, params, *, block_out=None):
    """x: (B, in_dim) float32.  params: dict of Linear/BN parameters.

    Linear weights are (in_dim, out_dim); biases and BN vectors are (1, dim).
    BatchNorm uses running statistics (inference semantics).
    """
    B, in_dim = x.shape
    hid_dim = params["w1"].shape[1]
    hid_dim2 = params["w2"].shape[1]
    out_dim = params["w3"].shape[1]
    eps = 1e-5

    # Fold BatchNorm (eval mode) into per-feature scale/shift in the wrapper:
    #   BN(t) = t * s + shift,  s = gamma / sqrt(var + eps),  shift = beta - mean * s
    s1 = params["g1"] * jax.lax.rsqrt(params["rv1"] + eps)
    t1 = params["be1"] - params["rm1"] * s1
    s2 = params["g2"] * jax.lax.rsqrt(params["rv2"] + eps)
    t2 = params["be2"] - params["rm2"] * s2

    # Tile only the (potentially large) final output dimension.
    block_out = out_dim if block_out is None else block_out
    n_tiles = pl.cdiv(out_dim, block_out)

    def fixed(shape):
        # Whole-array operand, same block every grid step (no re-DMA).
        return pl.BlockSpec(shape, lambda j: tuple(0 for _ in shape))

    in_specs = [
        fixed((B, in_dim)),                                   # x
        fixed((in_dim, hid_dim)), fixed((1, hid_dim)),        # w1, b1
        fixed((1, hid_dim)), fixed((1, hid_dim)),             # s1, t1
        fixed((hid_dim, hid_dim2)), fixed((1, hid_dim2)),     # w2, b2
        fixed((1, hid_dim2)), fixed((1, hid_dim2)),           # s2, t2
        pl.BlockSpec((hid_dim2, block_out), lambda j: (0, j)),  # w3 (tiled over out)
        pl.BlockSpec((1, block_out), lambda j: (0, j)),         # b3 (tiled over out)
    ]
    out_spec = pl.BlockSpec((B, block_out), lambda j: (0, j))

    return pl.pallas_call(
        _decoder_kernel,
        out_shape=jax.ShapeDtypeStruct((B, out_dim), jnp.float32),
        grid=(n_tiles,),
        in_specs=in_specs,
        out_specs=out_spec,
        scratch_shapes=[pltpu.VMEM((B, hid_dim2), jnp.float32)],
        compiler_params=pltpu.CompilerParams(
            # Scratch (h2) is written at tile 0 and read by later tiles, so
            # the output-tile axis must stay sequential.
            dimension_semantics=("arbitrary",),
        ),
    )(
        x,
        params["w1"], params["b1"], s1, t1,
        params["w2"], params["b2"], s2, t2,
        params["w3"], params["b3"],
    )


def _reference(x, p):
    """Pure-JAX reference mirroring the PyTorch forward (eval-mode BatchNorm)."""
    eps = 1e-5

    def bn(t, g, b, rm, rv):
        return (t - rm) / jnp.sqrt(rv + eps) * g + b

    def lrelu(t):
        return jnp.where(t >= 0, t, 0.2 * t)

    h = bn(lrelu(x @ p["w1"] + p["b1"]), p["g1"], p["be1"], p["rm1"], p["rv1"])
    h = bn(lrelu(h @ p["w2"] + p["b2"]), p["g2"], p["be2"], p["rm2"], p["rv2"])
    return lrelu(h @ p["w3"] + p["b3"])


def _make_params(key, in_dim, hid_dim, hid_dim2, out_dim):
    """Deterministic init; Linear weights stored as (in_dim, out_dim)."""
    keys = jax.random.split(key, 16)

    def lin_w(k, di, do):
        bound = 1.0 / math.sqrt(di)
        return jax.random.uniform(k, (di, do), jnp.float32, -bound, bound)

    def lin_b(k, di, do):
        bound = 1.0 / math.sqrt(di)
        return jax.random.uniform(k, (1, do), jnp.float32, -bound, bound)

    def bn_stats(k, d):
        km, kv, kg, kb = jax.random.split(k, 4)
        rm = 0.1 * jax.random.normal(km, (1, d), jnp.float32)
        rv = jax.random.uniform(kv, (1, d), jnp.float32, 0.5, 1.5)
        g = jax.random.uniform(kg, (1, d), jnp.float32, 0.8, 1.2)
        b = 0.1 * jax.random.normal(kb, (1, d), jnp.float32)
        return rm, rv, g, b

    rm1, rv1, g1, be1 = bn_stats(keys[4], hid_dim)
    rm2, rv2, g2, be2 = bn_stats(keys[5], hid_dim2)

    return {
        "w1": lin_w(keys[0], in_dim, hid_dim), "b1": lin_b(keys[1], in_dim, hid_dim),
        "rm1": rm1, "rv1": rv1, "g1": g1, "be1": be1,
        "w2": lin_w(keys[2], hid_dim, hid_dim2), "b2": lin_b(keys[3], hid_dim, hid_dim2),
        "rm2": rm2, "rv2": rv2, "g2": g2, "be2": be2,
        "w3": lin_w(keys[6], hid_dim2, out_dim), "b3": lin_b(keys[7], hid_dim2, out_dim),
    }


if __name__ == "__main__":
    # Small shapes consistent with the module (in_dim -> hid -> hid2 -> out).
    B, IN_DIM, HID_DIM, HID_DIM2, OUT_DIM = 8, 32, 64, 128, 256

    key = jax.random.PRNGKey(0)
    kx, kp = jax.random.split(key)
    x = jax.random.normal(kx, (B, IN_DIM), dtype=jnp.float32)
    params = _make_params(kp, IN_DIM, HID_DIM, HID_DIM2, OUT_DIM)

    out = decoder_profile(x, params)
    out = jax.block_until_ready(out)

    ref = _reference(x, params)
    np.testing.assert_allclose(np.asarray(out), np.asarray(ref), rtol=1e-4, atol=1e-4)

    print("KERNEL_OK")
</pallas_src>

<mosaic_0001>
module attributes {stable_mosaic.version = 11 : i64} {
  func.func @_decoder_kernel(%arg0: i32, %arg1: memref<8x32xf32, #tpu.memory_space<vmem>>, %arg2: memref<32x64xf32, #tpu.memory_space<vmem>>, %arg3: memref<1x64xf32, #tpu.memory_space<vmem>>, %arg4: memref<1x64xf32, #tpu.memory_space<vmem>>, %arg5: memref<1x64xf32, #tpu.memory_space<vmem>>, %arg6: memref<64x128xf32, #tpu.memory_space<vmem>>, %arg7: memref<1x128xf32, #tpu.memory_space<vmem>>, %arg8: memref<1x128xf32, #tpu.memory_space<vmem>>, %arg9: memref<1x128xf32, #tpu.memory_space<vmem>>, %arg10: memref<128x256xf32, #tpu.memory_space<vmem>>, %arg11: memref<1x256xf32, #tpu.memory_space<vmem>>, %arg12: memref<8x256xf32, #tpu.memory_space<vmem>>, %arg13: memref<8x128xf32, #tpu.memory_space<vmem>>) attributes {dimension_semantics = [#tpu.dimension_semantics<arbitrary>], iteration_bounds = array<i64: 1>, scalar_prefetch = 0 : i64, scratch_operands = 1 : i64, tpu.core_type = #tpu.core_type<tc>, window_params = [{pipeline_mode = #tpu.pipeline_mode<synchronous>, transform_indices = @transform_0, window_bounds = array<i64: 8, 32>}, {pipeline_mode = #tpu.pipeline_mode<synchronous>, transform_indices = @transform_1, window_bounds = array<i64: 32, 64>}, {pipeline_mode = #tpu.pipeline_mode<synchronous>, transform_indices = @transform_2, window_bounds = array<i64: 1, 64>}, {pipeline_mode = #tpu.pipeline_mode<synchronous>, transform_indices = @transform_3, window_bounds = array<i64: 1, 64>}, {pipeline_mode = #tpu.pipeline_mode<synchronous>, transform_indices = @transform_4, window_bounds = array<i64: 1, 64>}, {pipeline_mode = #tpu.pipeline_mode<synchronous>, transform_indices = @transform_5, window_bounds = array<i64: 64, 128>}, {pipeline_mode = #tpu.pipeline_mode<synchronous>, transform_indices = @transform_6, window_bounds = array<i64: 1, 128>}, {pipeline_mode = #tpu.pipeline_mode<synchronous>, transform_indices = @transform_7, window_bounds = array<i64: 1, 128>}, {pipeline_mode = #tpu.pipeline_mode<synchronous>, transform_indices = @transform_8, window_bounds = array<i64: 1, 128>}, {transform_indices = @transform_9, window_bounds = array<i64: 128, 256>}, {transform_indices = @transform_10, window_bounds = array<i64: 1, 256>}, {transform_indices = @transform_11, window_bounds = array<i64: 8, 256>}]} {
    %c0_i32 = arith.constant 0 : i32
    %0 = arith.cmpi eq, %arg0, %c0_i32 : i32
    %1 = arith.extui %0 : i1 to i32
    %c0_i32_0 = arith.constant 0 : i32
    %2 = arith.cmpi ne, %1, %c0_i32_0 : i32
    scf.if %2 {
      %c0_10 = arith.constant 0 : index
      %c0_11 = arith.constant 0 : index
      %15 = vector.load %arg1[%c0_10, %c0_11] : memref<8x32xf32, #tpu.memory_space<vmem>>, vector<8x32xf32>
      %c0_12 = arith.constant 0 : index
      %c0_13 = arith.constant 0 : index
      %16 = vector.load %arg2[%c0_12, %c0_13] : memref<32x64xf32, #tpu.memory_space<vmem>>, vector<32x64xf32>
      %cst_14 = arith.constant dense<0.000000e+00> : vector<8x64xf32>
      %17 = tpu.matmul %15, %16, %cst_14 {dimension_numbers = #tpu.dot_dimension_numbers<[1], [0], [0], [1], [0, 0, 1, 1], [], []>} : vector<8x32xf32>, vector<32x64xf32>, vector<8x64xf32> -> vector<8x64xf32>
      %c0_15 = arith.constant 0 : index
      %c0_16 = arith.constant 0 : index
      %18 = vector.load %arg3[%c0_15, %c0_16] : memref<1x64xf32, #tpu.memory_space<vmem>>, vector<1x64xf32>
      %19 = vector.broadcast %18 : vector<1x64xf32> to vector<8x64xf32>
      %20 = arith.addf %17, %19 : vector<8x64xf32>
      %cst_17 = arith.constant 0.000000e+00 : f32
      %21 = vector.broadcast %cst_17 : f32 to vector<8x64xf32>
      %22 = arith.cmpf oge, %20, %21 : vector<8x64xf32>
      %cst_18 = arith.constant 2.000000e-01 : f32
      %23 = vector.broadcast %cst_18 : f32 to vector<8x64xf32>
      %24 = arith.mulf %23, %20 : vector<8x64xf32>
      %25 = arith.select %22, %20, %24 : vector<8x64xi1>, vector<8x64xf32>
      %c0_19 = arith.constant 0 : index
      %c0_20 = arith.constant 0 : index
      %26 = vector.load %arg4[%c0_19, %c0_20] : memref<1x64xf32, #tpu.memory_space<vmem>>, vector<1x64xf32>
      %27 = vector.broadcast %26 : vector<1x64xf32> to vector<8x64xf32>
      %28 = arith.mulf %25, %27 : vector<8x64xf32>
      %c0_21 = arith.constant 0 : index
      %c0_22 = arith.constant 0 : index
      %29 = vector.load %arg5[%c0_21, %c0_22] : memref<1x64xf32, #tpu.memory_space<vmem>>, vector<1x64xf32>
      %30 = vector.broadcast %29 : vector<1x64xf32> to vector<8x64xf32>
      %31 = arith.addf %28, %30 : vector<8x64xf32>
      %c0_23 = arith.constant 0 : index
      %c0_24 = arith.constant 0 : index
      %32 = vector.load %arg6[%c0_23, %c0_24] : memref<64x128xf32, #tpu.memory_space<vmem>>, vector<64x128xf32>
      %cst_25 = arith.constant dense<0.000000e+00> : vector<8x128xf32>
      %33 = tpu.matmul %31, %32, %cst_25 {dimension_numbers = #tpu.dot_dimension_numbers<[1], [0], [0], [1], [0, 0, 1, 1], [], []>} : vector<8x64xf32>, vector<64x128xf32>, vector<8x128xf32> -> vector<8x128xf32>
      %c0_26 = arith.constant 0 : index
      %c0_27 = arith.constant 0 : index
      %34 = vector.load %arg7[%c0_26, %c0_27] : memref<1x128xf32, #tpu.memory_space<vmem>>, vector<1x128xf32>
      %35 = vector.broadcast %34 : vector<1x128xf32> to vector<8x128xf32>
      %36 = arith.addf %33, %35 : vector<8x128xf32>
      %cst_28 = arith.constant 0.000000e+00 : f32
      %37 = vector.broadcast %cst_28 : f32 to vector<8x128xf32>
      %38 = arith.cmpf oge, %36, %37 : vector<8x128xf32>
      %cst_29 = arith.constant 2.000000e-01 : f32
      %39 = vector.broadcast %cst_29 : f32 to vector<8x128xf32>
      %40 = arith.mulf %39, %36 : vector<8x128xf32>
      %41 = arith.select %38, %36, %40 : vector<8x128xi1>, vector<8x128xf32>
      %c0_30 = arith.constant 0 : index
      %c0_31 = arith.constant 0 : index
      %42 = vector.load %arg8[%c0_30, %c0_31] : memref<1x128xf32, #tpu.memory_space<vmem>>, vector<1x128xf32>
      %43 = vector.broadcast %42 : vector<1x128xf32> to vector<8x128xf32>
      %44 = arith.mulf %41, %43 : vector<8x128xf32>
      %c0_32 = arith.constant 0 : index
      %c0_33 = arith.constant 0 : index
      %45 = vector.load %arg9[%c0_32, %c0_33] : memref<1x128xf32, #tpu.memory_space<vmem>>, vector<1x128xf32>
      %46 = vector.broadcast %45 : vector<1x128xf32> to vector<8x128xf32>
      %47 = arith.addf %44, %46 : vector<8x128xf32>
      %c0_34 = arith.constant 0 : index
      %c0_35 = arith.constant 0 : index
      %48 = vector.load %arg13[%c0_34, %c0_35] : memref<8x128xf32, #tpu.memory_space<vmem>>, vector<8x128xf32>
      tpu.vector_store %arg13[%c0_34, %c0_35], %47 {strides = array<i32>} : memref<8x128xf32, #tpu.memory_space<vmem>>, vector<8x128xf32>,
    } else {
    }
    %c0 = arith.constant 0 : index
    %c0_1 = arith.constant 0 : index
    %3 = vector.load %arg13[%c0, %c0_1] : memref<8x128xf32, #tpu.memory_space<vmem>>, vector<8x128xf32>
    %c0_2 = arith.constant 0 : index
    %c0_3 = arith.constant 0 : index
    %4 = vector.load %arg10[%c0_2, %c0_3] : memref<128x256xf32, #tpu.memory_space<vmem>>, vector<128x256xf32>
    %cst = arith.constant dense<0.000000e+00> : vector<8x256xf32>
    %5 = tpu.matmul %3, %4, %cst {dimension_numbers = #tpu.dot_dimension_numbers<[1], [0], [0], [1], [0, 0, 1, 1], [], []>} : vector<8x128xf32>, vector<128x256xf32>, vector<8x256xf32> -> vector<8x256xf32>
    %c0_4 = arith.constant 0 : index
    %c0_5 = arith.constant 0 : index
    %6 = vector.load %arg11[%c0_4, %c0_5] : memref<1x256xf32, #tpu.memory_space<vmem>>, vector<1x256xf32>
    %7 = vector.broadcast %6 : vector<1x256xf32> to vector<8x256xf32>
    %8 = arith.addf %5, %7 : vector<8x256xf32>
    %cst_6 = arith.constant 0.000000e+00 : f32
    %9 = vector.broadcast %cst_6 : f32 to vector<8x256xf32>
    %10 = arith.cmpf oge, %8, %9 : vector<8x256xf32>
    %cst_7 = arith.constant 2.000000e-01 : f32
    %11 = vector.broadcast %cst_7 : f32 to vector<8x256xf32>
    %12 = arith.mulf %11, %8 : vector<8x256xf32>
    %13 = arith.select %10, %8, %12 : vector<8x256xi1>, vector<8x256xf32>
    %c0_8 = arith.constant 0 : index
    %c0_9 = arith.constant 0 : index
    %14 = vector.load %arg12[%c0_8, %c0_9] : memref<8x256xf32, #tpu.memory_space<vmem>>, vector<8x256xf32>
    tpu.vector_store %arg12[%c0_8, %c0_9], %13 {strides = array<i32>} : memref<8x256xf32, #tpu.memory_space<vmem>>, vector<8x256xf32>,
    return
  }
  func.func @transform_0(%arg0: i32) -> (i32, i32) {
    %c0_i32 = arith.constant 0 : i32
    %c0_i32_0 = arith.constant 0 : i32
    %c0_i32_1 = arith.constant 0 : i32
    return %c0_i32, %c0_i32_0 : i32, i32
  }
  func.func @transform_1(%arg0: i32) -> (i32, i32) {
    %c0_i32 = arith.constant 0 : i32
    %c0_i32_0 = arith.constant 0 : i32
    %c0_i32_1 = arith.constant 0 : i32
    return %c0_i32, %c0_i32_0 : i32, i32
  }
  func.func @transform_2(%arg0: i32) -> (i32, i32) {
    %c0_i32 = arith.constant 0 : i32
    %c0_i32_0 = arith.constant 0 : i32
    %c0_i32_1 = arith.constant 0 : i32
    return %c0_i32, %c0_i32_0 : i32, i32
  }
  func.func @transform_3(%arg0: i32) -> (i32, i32) {
    %c0_i32 = arith.constant 0 : i32
    %c0_i32_0 = arith.constant 0 : i32
    %c0_i32_1 = arith.constant 0 : i32
    return %c0_i32, %c0_i32_0 : i32, i32
  }
  func.func @transform_4(%arg0: i32) -> (i32, i32) {
    %c0_i32 = arith.constant 0 : i32
    %c0_i32_0 = arith.constant 0 : i32
    %c0_i32_1 = arith.constant 0 : i32
    return %c0_i32, %c0_i32_0 : i32, i32
  }
  func.func @transform_5(%arg0: i32) -> (i32, i32) {
    %c0_i32 = arith.constant 0 : i32
    %c0_i32_0 = arith.constant 0 : i32
    %c0_i32_1 = arith.constant 0 : i32
    return %c0_i32, %c0_i32_0 : i32, i32
  }
  func.func @transform_6(%arg0: i32) -> (i32, i32) {
    %c0_i32 = arith.constant 0 : i32
    %c0_i32_0 = arith.constant 0 : i32
    %c0_i32_1 = arith.constant 0 : i32
    return %c0_i32, %c0_i32_0 : i32, i32
  }
  func.func @transform_7(%arg0: i32) -> (i32, i32) {
    %c0_i32 = arith.constant 0 : i32
    %c0_i32_0 = arith.constant 0 : i32
    %c0_i32_1 = arith.constant 0 : i32
    return %c0_i32, %c0_i32_0 : i32, i32
  }
  func.func @transform_8(%arg0: i32) -> (i32, i32) {
    %c0_i32 = arith.constant 0 : i32
    %c0_i32_0 = arith.constant 0 : i32
    %c0_i32_1 = arith.constant 0 : i32
    return %c0_i32, %c0_i32_0 : i32, i32
  }
  func.func @transform_9(%arg0: i32) -> (i32, i32) {
    %c0_i32 = arith.constant 0 : i32
    %c0_i32_0 = arith.constant 0 : i32
    return %c0_i32, %arg0 : i32, i32
  }
  func.func @transform_10(%arg0: i32) -> (i32, i32) {
    %c0_i32 = arith.constant 0 : i32
    %c0_i32_0 = arith.constant 0 : i32
    return %c0_i32, %arg0 : i32, i32
  }
  func.func @transform_11(%arg0: i32) -> (i32, i32) {
    %c0_i32 = arith.constant 0 : i32
    %c0_i32_0 = arith.constant 0 : i32
    return %c0_i32, %arg0 : i32, i32
  }
}

</mosaic_0001>

<bundles_post_ra>
// kernel: tpu_custom_call.1
= control target key start
LH: loop header
LB: loop body
LE: loop exit
PB: predicated region body
PF: predicated region fallthrough
CT: control target
= control target key end

     0   :  { %16 = vsyncpa [#allocation4], 0  ;;  %s731_s0 = inlined_call_operand.hbm [shape: f32[8,32], index: 0, kind: input, shape index: {}]   ;;  %s732_s1 = inlined_call_operand.hbm [shape: f32[32,64], index: 1, kind: input, shape index: {}]   ;;  %s733_s2 = inlined_call_operand.vmem [shape: f32[1,64], index: 2, kind: input, shape index: {}]   ;;  %s734_s3 = inlined_call_operand.vmem [shape: f32[1,64], index: 3, kind: input, shape index: {}]   ;;  %s735_s4 = inlined_call_operand.vmem [shape: f32[1,64], index: 4, kind: input, shape index: {}]   ;;  %s736_s5 = inlined_call_operand.hbm [shape: f32[64,128], index: 5, kind: input, shape index: {}]   ;;  %s737_s6 = inlined_call_operand.vmem [shape: f32[1,128], index: 6, kind: input, shape index: {}]   ;;  %s738_s7 = inlined_call_operand.vmem [shape: f32[1,128], index: 7, kind: input, shape index: {}]   ;;  %s739_s8 = inlined_call_operand.vmem [shape: f32[1,128], index: 8, kind: input, shape index: {}]   ;;  %s740_s9 = inlined_call_operand.hbm [shape: f32[128,256], index: 9, kind: input, shape index: {}]   ;;  %s741_s10 = inlined_call_operand.vmem [shape: f32[1,256], index: 10, kind: input, shape index: {}]   ;;  %s742_s11 = inlined_call_operand.hbm [shape: f32[8,256], index: 11, kind: output, shape index: {}]  }
   0x1   :  { %17 = vsyncpa [#allocation7], 0 }
   0x2   :  { %18 = vsyncpa [#allocation10], 0 }
   0x3   :  { %19 = vsyncpa [#allocation5], 0  ;;  %s622_s17 = smov [#allocation6]  }
   0x4   :  { %s35_s18 = sshll.u32 %s622_s17, 4  ;;  %s36_s18 = int_to_ptr.vmem [resolvable:$true] %s35_s18 }
   0x5   :  { %s522_s19 = scalar_lea.vmem %s36_s18, 512  ;;  %p527_p1 = scmp.lt.s32.totalorder %s36_s18, %s36_s18 }
   0x6   :  { %p523_p0 = scmp.ne.s32.totalorder %s36_s18, %s522_s19  ;;  %p528_p2 = scmp.lt.s32.totalorder %s522_s19, %s522_s19 }
   0x8   :  { %p529_p3 = por %p528_p2, %p527_p1 }
   0xa   :  { %p530_p4 = pnand %p529_p3, %p523_p0 }
   0xc   :  { %533 = shalt.err (!%p530_p4)
}
   0xd   :  { %s623_s20 = smov 128   ;;  %s624_s21 = smov 8  }
   0xe   :  { %41 = dma.hbm_to_vmem [thread:$0]  %s732_s1, 512, %s36_s18, [#allocation7], %s623_s20, %s623_s20, %s624_s21  }
   0xf   :  { %s625_s24 = smov [#allocation3]   ;;  %s626_s26 = smov [#allocation8]  }
  0x10   :  { %s26_s25 = sshll.u32 %s625_s24, 4  ;;  %s53_s27 = sshll.u32 %s626_s26, 4  ;;  %s27_s25 = int_to_ptr.vmem [resolvable:$true] %s26_s25  ;;  %s54_s27 = int_to_ptr.vmem [resolvable:$true] %s53_s27 }
  0x11   :  { %s542_s28 = scalar_lea.vmem %s27_s25, 128  ;;  %p547_p6 = scmp.lt.s32.totalorder %s27_s25, %s27_s25 }
  0x12   :  { %p543_p5 = scmp.ne.s32.totalorder %s27_s25, %s542_s28  ;;  %p548_p7 = scmp.lt.s32.totalorder %s542_s28, %s542_s28 }
  0x14   :  { %p549_p8 = por %p548_p7, %p547_p6 }
  0x16   :  { %p550_p9 = pnand %p549_p8, %p543_p5 }
  0x18   :  { %553 = shalt.err (!%p550_p9)
}
  0x19   :  { %29 = dma.hbm_to_vmem [thread:$0]  %s731_s0, 128, %s27_s25, [#allocation4]  }
  0x1a   :  { %s562_s12 = scalar_lea.vmem %s54_s27, 1024  ;;  %p567_p11 = scmp.lt.s32.totalorder %s54_s27, %s54_s27 }
  0x1b   :  { %p563_p10 = scmp.ne.s32.totalorder %s54_s27, %s562_s12  ;;  %p568_p12 = scmp.lt.s32.totalorder %s562_s12, %s562_s12 }
  0x1d   :  { %p569_p13 = por %p568_p12, %p567_p11 }
  0x1f   :  { %p570_p0 = pnand %p569_p13, %p563_p10 }
  0x21   :  { %573 = shalt.err (!%p570_p0)
}
  0x22   :  { %59 = dma.hbm_to_vmem [thread:$0]  %s736_s5, 1024, %s54_s27, [#allocation7], %s623_s20, %s623_s20, %s624_s21  }
  0x23   :  { %s627_s14 = smov [#allocation9]  }
  0x24   :  { %s71_s15 = sshll.u32 %s627_s14, 4  ;;  %s72_s15 = int_to_ptr.vmem [resolvable:$true] %s71_s15 }
  0x25   :  { %s582_s16 = scalar_lea.vmem %s72_s15, 4096  ;;  %p587_p2 = scmp.lt.s32.totalorder %s72_s15, %s72_s15 }
  0x26   :  { %p583_p1 = scmp.ne.s32.totalorder %s72_s15, %s582_s16  ;;  %p588_p3 = scmp.lt.s32.totalorder %s582_s16, %s582_s16 }
  0x28   :  { %p589_p4 = por %p588_p3, %p587_p2 }
  0x2a   :  { %p590_p5 = pnand %p589_p4, %p583_p1 }
  0x2c   :  { %593 = shalt.err (!%p590_p5)
}
  0x2d   :  { %s628_s0 = smov 256   ;;  %s629_s17 = smov 16  }
  0x2e   :  { %77 = dma.hbm_to_vmem [thread:$0]  %s740_s9, 4096, %s72_s15, [#allocation10], %s628_s0, %s628_s0, %s629_s17  }
  0x2f   :  { %614 = dma.done.wait [#allocation4], 128  }
  0x30   :  { %615 = vsyncadd [#allocation4], 4294967168 }
  0x31   :  { %616 = dma.done.wait [#allocation7], 1536  }
  0x32   :  { %617 = vsyncadd [#allocation7], 4294965760 }
  0x33   :  { %618 = dma.done.wait [#allocation10], 4096  }
  0x34   :  { %619 = vsyncadd [#allocation10], 4294963200  ;;  %v630_v0 = vmov 0.0   ;;  %vm631_vm0 = vmmov 0   ;;  %v100_v1 = vld [vmem:[#allocation6 + $0x18] sm:$0xff]  ;;  %v99_v2 = vld [vmem:[#allocation6 + $0x10] sm:$0xff] }
  0x35   :  { %473 = vmatprep.subr.mxu1 %v630_v0  ;;  %481 = vmatprep.mubr.msk.f32.mxu1 %vm631_vm0, %v630_v0  ;;  %v98_v3 = vld [vmem:[#allocation6 + $0x8] sm:$0xff]  ;;  %v97_v4 = vld [vmem:[#allocation6] sm:$0xff]  ;;  %v96_v5 = vld [vmem:[#allocation3] sm:$0xff]  ;;  %vm108_vm1 = vcmask 261120   ;;  %vm216_vm3 = vcmask 523264  }
  0x36   :  { %419 = vmatprep.mubr.f32.mxu0 %v630_v0  ;;  %474 = vmatpush3.msra.mxu1 %v100_v1  ;;  %v208_v6 = vld [vmem:[#allocation8 + $0x38] sm:$0xff]  ;;  %v207_v7 = vld [vmem:[#allocation8 + $0x30] sm:$0xff]  ;;  %v206_v8 = vld [vmem:[#allocation8 + $0x28] sm:$0xff] }
  0x37   :  { %475 = vmatprep.subr.mxu1 %v630_v0  ;;  %v205_v9 = vld [vmem:[#allocation8 + $0x20] sm:$0xff]  ;;  %v204_v10 = vld [vmem:[#allocation8 + $0x18] sm:$0xff]  ;;  %v203_v11 = vld [vmem:[#allocation8 + $0x10] sm:$0xff] }
  0x38   :  { %476 = vmatpush3.msra.mxu1 %v99_v2  ;;  %v202_v12 = vld [vmem:[#allocation8 + $0x8] sm:$0xff]  ;;  %v201_v13 = vld [vmem:[#allocation8] sm:$0xff]  ;;  %v342_v14 = vld [vmem:[#allocation9 + $0xf8] sm:$0xff]  ;;  %v345_v2 = vlaneseq }
  0x39   :  { %477 = vmatprep.subr.mxu1 %v630_v0  ;;  %v341_v15 = vld [vmem:[#allocation9 + $0xf0] sm:$0xff]  ;;  %v340_v16 = vld [vmem:[#allocation9 + $0xe8] sm:$0xff]  ;;  %355 = vmatprep.subr.mxu0 %v342_v14  ;;  %v339_v17 = vld [vmem:[#allocation9 + $0xe0] sm:$0xff] }
  0x3a   :  { %478 = vmatpush3.msra.mxu1 %v98_v3  ;;  %356 = vmatpush1.msra.mxu0 %v341_v15  ;;  %v338_v18 = vld [vmem:[#allocation9 + $0xd8] sm:$0xff]  ;;  %v337_v19 = vld [vmem:[#allocation9 + $0xd0] sm:$0xff]  ;;  %v336_v20 = vld [vmem:[#allocation9 + $0xc8] sm:$0xff]  ;;  %v346_v3 = vshrl.u32 %v345_v2, 7 }
  0x3b   :  { %479 = vmatprep.subr.mxu1 %v630_v0  ;;  %357 = vmatprep.subr.mxu0 %v340_v16  ;;  %v335_v21 = vld [vmem:[#allocation9 + $0xc0] sm:$0xff]  ;;  %v334_v22 = vld [vmem:[#allocation9 + $0xb8] sm:$0xff]  ;;  %v333_v23 = vld [vmem:[#allocation9 + $0xb0] sm:$0xff] }
  0x3c   :  { %480 = vmatpush3.msra.mxu1 %v97_v4  ;;  %358 = vmatpush1.msra.mxu0 %v339_v17  ;;  %v332_v24 = vld [vmem:[#allocation9 + $0xa8] sm:$0xff]  ;;  %v331_v25 = vld [vmem:[#allocation9 + $0xa0] sm:$0xff]  ;;  %v330_v26 = vld [vmem:[#allocation9 + $0x98] sm:$0xff]  ;;  %v347_v4 = vsub.s32 0, %v346_v3 }
  0x3d   :  { %482 = vmatmul.mubr.msk.f32.vlgmr.msra.gmra.mxu1 %vm108_vm1, %v96_v5  ;;  %484 = vmatprep.subr.mxu1 %v630_v0  ;;  %v329_v27 = vld [vmem:[#allocation9 + $0x90] sm:$0xff]  ;;  %v328_v28 = vld [vmem:[#allocation9 + $0x88] sm:$0xff]  ;;  %v327_v29 = vld [vmem:[#allocation9 + $0x80] sm:$0xff] }
  0x3e   :  { %485 = vmatpush3.msra.mxu1 %v208_v6  ;;  %500 = vmatprep.mubr.msk.f32.mxu1 %vm631_vm0, %v630_v0  ;;  %v326_v30 = vld [vmem:[#allocation9 + $0x78] sm:$0xff]  ;;  %v325_v31 = vld [vmem:[#allocation9 + $0x70] sm:$0xff]  ;;  %v324_v32 = vld [vmem:[#allocation9 + $0x68] sm:$0xff]  ;;  %v351_v6 = vsub.s32 1, %v346_v3 }
  0x3f   :  { %486 = vmatprep.subr.mxu1 %v630_v0  ;;  %359 = vmatprep.subr.mxu0 %v338_v18  ;;  %v323_v33 = vld [vmem:[#allocation9 + $0x60] sm:$0xff]  ;;  %v322_v34 = vld [vmem:[#allocation9 + $0x58] sm:$0xff]  ;;  %v321_v35 = vld [vmem:[#allocation9 + $0x50] sm:$0xff] }
  0x40   :  { %487 = vmatpush3.msra.mxu1 %v207_v7  ;;  %360 = vmatpush1.msra.mxu0 %v337_v19  ;;  %v451_v36 = vld [vmem:[%s733_s2] ss:$0 sm:$0xff]  ;;  %v320_v46 = vld [vmem:[#allocation9 + $0x48] sm:$0xff]  ;;  %v319_v47 = vld [vmem:[#allocation9 + $0x40] sm:$0xff] }
  0x41   :  { %488 = vmatprep.subr.mxu1 %v630_v0  ;;  %361 = vmatprep.subr.mxu0 %v336_v20  ;;  %v453_v41 = vld [vmem:[%s734_s3] ss:$0 sm:$0xff]  ;;  %v317_v49 = vld [vmem:[#allocation9 + $0x30] sm:$0xff]  ;;  %v316_v50 = vld [vmem:[#allocation9 + $0x28] sm:$0xff] }
  0x42   :  { %489 = vmatpush3.msra.mxu1 %v206_v8  ;;  %362 = vmatpush1.msra.mxu0 %v335_v21  ;;  %v454_v43 = vld [vmem:[%s735_s4] ss:$0 sm:$0xff]  ;;  %v315_v51 = vld [vmem:[#allocation9 + $0x20] sm:$0xff]  ;;  %v313_v53 = vld [vmem:[#allocation9 + $0x10] sm:$0xff] }
  0x43   :  { %490 = vmatprep.subr.mxu1 %v630_v0  ;;  %363 = vmatprep.subr.mxu0 %v334_v22  ;;  %v318_v48 = vld [vmem:[#allocation9 + $0x38] sm:$0xff]  ;;  %v312_v54 = vld [vmem:[#allocation9 + $0x8] sm:$0xff]  ;;  %v311_v55 = vld [vmem:[#allocation9] sm:$0xff] }
  0x44   :  { %491 = vmatpush3.msra.mxu1 %v205_v9  ;;  %364 = vmatpush1.msra.mxu0 %v333_v23  ;;  %v314_v52 = vld [vmem:[#allocation9 + $0x18] sm:$0xff] }
  0x45   :  { %492 = vmatprep.subr.mxu1 %v630_v0  ;;  %365 = vmatprep.subr.mxu0 %v332_v24  ;;  %v455_v56 = vld [vmem:[%s737_s6] ss:$0 sm:$0xff] }
  0x46   :  { %493 = vmatpush3.msra.mxu1 %v204_v10  ;;  %366 = vmatpush1.msra.mxu0 %v331_v25  ;;  %v457_v61 = vld [vmem:[%s738_s7] ss:$0 sm:$0xff]  ;;  %s632_s7 = smov [#allocation11]  }
  0x47   :  { %494 = vmatprep.subr.mxu1 %v630_v0  ;;  %367 = vmatprep.subr.mxu0 %v330_v26  ;;  %v458_v63 = vld [vmem:[%s739_s8] ss:$0 sm:$0xff]  ;;  %s440_s8 = sshll.u32 %s632_s7, 4  ;;  %s441_s8 = int_to_ptr.vmem [resolvable:$true] %s440_s8 }
  0x48   :  { %495 = vmatpush3.msra.mxu1 %v203_v11  ;;  %368 = vmatpush1.msra.mxu0 %v329_v27  ;;  %v343_v5 = vld [vmem:[%s741_s10] sm:$0x3]  ;;  %s594_s28 = scalar_lea.vmem %s441_s8, 256  ;;  %p599_p7 = scmp.lt.s32.totalorder %s441_s8, %s441_s8 }
  0x49   :  { %496 = vmatprep.subr.mxu1 %v630_v0  ;;  %369 = vmatprep.subr.mxu0 %v328_v28  ;;  %v348_v7 = vrot.slane %v343_v5, %v347_v4  ;;  %v352_v8 = vrot.slane %v343_v5, %v351_v6  ;;  %p595_p6 = scmp.ne.s32.totalorder %s441_s8, %s594_s28  ;;  %p600_p8 = scmp.lt.s32.totalorder %s594_s28, %s594_s28 }
  0x4a   :  { %497 = vmatpush3.msra.mxu1 %v202_v12  ;;  %370 = vmatpush1.msra.mxu0 %v327_v29 }
  0x4b   :  { %498 = vmatprep.subr.mxu1 %v630_v0  ;;  %371 = vmatprep.subr.mxu0 %v326_v30  ;;  %p601_p9 = por %p600_p8, %p599_p7 }
  0x4c   :  { %499 = vmatpush3.msra.mxu1 %v201_v13  ;;  %372 = vmatpush1.msra.mxu0 %v325_v31 }
  0x4d   :  { %373 = vmatprep.subr.mxu0 %v324_v32  ;;  %p602_p10 = pnand %p601_p9, %p595_p6 }
  0x4e   :  { %374 = vmatpush1.msra.mxu0 %v323_v33 }
  0x4f   :  { %375 = vmatprep.subr.mxu0 %v322_v34 }
  0x50   :  { %376 = vmatpush1.msra.mxu0 %v321_v35 }
  0x51   :  { %377 = vmatprep.subr.mxu0 %v320_v46 }
  0x52   :  { %378 = vmatpush1.msra.mxu0 %v319_v47 }
  0x53   :  { %379 = vmatprep.subr.mxu0 %v318_v48 }
  0x54   :  { %380 = vmatpush1.msra.mxu0 %v317_v49 }
  0x55   :  { %381 = vmatprep.subr.mxu0 %v316_v50 }
  0x56   :  { %382 = vmatpush1.msra.mxu0 %v315_v51 }
  0x57   :  { %383 = vmatprep.subr.mxu0 %v314_v52 }
  0x58   :  { %384 = vmatpush1.msra.mxu0 %v313_v53 }
  0x59   :  { %385 = vmatprep.subr.mxu0 %v312_v54 }
  0x5a   :  { %386 = vmatpush1.msra.mxu0 %v311_v55 }
  0xfd   :  { %v178_v37 = vpop.f32.mrf.mxu1 }
  0xfe   :  { %v179_v38 = vadd.f32 %v451_v36, %v178_v37 }
  0xff   :  { %v483_v39 = vpop.f32.mrf.mxu1 }
 0x100   :  { %vm182_vm2 = vcmp.ge.f32.partialorder %v179_v38, 0.0  ;;  %v183_v40 = vmul.f32 0.2, %v179_v38 }
 0x102   :  { %v184_v42 = vsel %vm182_vm2, %v179_v38, %v183_v40 }
 0x103   :  { %v192_v44 = vmul.f32 %v453_v41, %v184_v42 }
 0x105   :  { %v200_v45 = vadd.f32 %v454_v43, %v192_v44 }
 0x107   :  { %501 = vmatmul.mubr.msk.f32.vlgmr.msra.gmra.mxu1 %vm216_vm3, %v200_v45 }
 0x1c7   :  { %v286_v57 = vpop.f32.mrf.mxu1 }
 0x1c8   :  { %v287_v58 = vadd.f32 %v455_v56, %v286_v57 }
 0x1c9   :  { %v502_v59 = vpop.f32.mrf.mxu1 }
 0x1ca   :  { %vm290_vm4 = vcmp.ge.f32.partialorder %v287_v58, 0.0  ;;  %v291_v60 = vmul.f32 0.2, %v287_v58 }
 0x1cc   :  { %v292_v62 = vsel %vm290_vm4, %v287_v58, %v291_v60 }
 0x1cd   :  { %v300_v0 = vmul.f32 %v457_v61, %v292_v62 }
 0x1cf   :  { %v308_v1 = vadd.f32 %v458_v63, %v300_v0 }
 0x1d1   :  { %420 = vmatmul.mubr.f32.vlgmr.msra.gmra.mxu0 %v308_v1 }
 0x291   :  { %v421_v9 = vpop.f32.mrf.mxu0 }
 0x292   :  { %v422_v10 = vadd.f32 %v421_v9, %v348_v7 }
 0x293   :  { %v423_v11 = vpop.f32.mrf.mxu0 }
 0x294   :  { %vm426_vm5 = vcmp.ge.f32.partialorder %v422_v10, 0.0  ;;  %v428_v12 = vmul.f32 0.2, %v422_v10  ;;  %v424_v13 = vadd.f32 %v423_v11, %v352_v8 }
 0x296   :  { %vm427_vm6 = vcmp.ge.f32.partialorder %v424_v13, 0.0  ;;  %v429_v14 = vmul.f32 0.2, %v424_v13  ;;  %v430_v15 = vsel %vm426_vm5, %v422_v10, %v428_v12 }
 0x297   :  { %432 = vst [vmem:[#allocation11] sm:$0xff] %v430_v15 }
 0x298   :  { %v431_v16 = vsel %vm427_vm6, %v424_v13, %v429_v14 }
 0x299   :  { %433 = vst [vmem:[#allocation11 + $0x8] sm:$0xff] %v431_v16 }
 0x29a   :  { %605 = shalt.err (!%p602_p10)
}
 0x29b   :  { %443 = dma.vmem_to_hbm [thread:$0]  %s441_s8, 256, %s742_s11, [#allocation5]  }
 0x29c   :  { %620 = dma.done.wait [#allocation5], 256  }
 0x29d   :  { %621 = vsyncadd [#allocation5], 4294967040 }
 0x29e   :  { %447 = vsyncpa [#allocation4], 1 }
 0x29f   :  { %448 = vsyncpa [#allocation7], 1 }
 0x2a0   :  { %449 = vsyncpa [#allocation10], 1 }
 0x2a1   :  { %450 = vsyncpa [#allocation5], 1 }

</bundles_post_ra>
